<compile_context>
chip_gen: v7x
topology: tpu7x:2x2x1
jax: 0.10.0
libtpu: 0.0.40
codegen_flags: <defaults>
</compile_context>

<pallas_src>
import math

import jax
import jax.numpy as jnp
from jax.experimental import pallas as pl
from jax.experimental.pallas import tpu as pltpu

D = 6
W = 128
IN_CH_W = 8
IN_CH_XYZ = 34
IN_CH = IN_CH_XYZ + IN_CH_W  # 42
SKIP = 4
OUT_CH = 2


def _mlp_kernel(x_ref, w01_ref, wh_ref, b_ref, wo_ref, bo_ref, o_ref):
    bf16 = jnp.bfloat16
    x = x_ref[...]                                           # (tb, 42) bf16

    # Fused layer-1 + skip-branch matmul: x @ [w0 | w4a] -> (tb, 256) f32.
    xw = jnp.dot(x, w01_ref[...], preferred_element_type=jnp.float32)
    skip = xw[:, W:]                                         # (tb, 128) f32 stash
    h = jnp.maximum(xw[:, :W] + b_ref[0], 0.0)               # layer 1: 42 -> 128

    def lin_relu(h, w, b):
        y = jnp.dot(h.astype(bf16), w, preferred_element_type=jnp.float32) + b
        return jnp.maximum(y, 0.0)

    h = lin_relu(h, wh_ref[0], b_ref[1])                     # layer 2
    h = lin_relu(h, wh_ref[1], b_ref[2])                     # layer 3
    h = lin_relu(h, wh_ref[2], b_ref[3])                     # layer 4
    # layer 5 (skip): cat([x, h]) @ W4 == x @ W4[:42] + h @ W4[42:]
    y = (skip
         + jnp.dot(h.astype(bf16), wh_ref[3], preferred_element_type=jnp.float32)
         + b_ref[4])
    h = jnp.maximum(y, 0.0)
    h = lin_relu(h, wh_ref[4], b_ref[5])                     # layer 6
    # output layer (weights zero-padded 2 -> 128 columns; lane-dense store)
    o_ref[...] = (jnp.dot(h.astype(bf16), wo_ref[...],
                          preferred_element_type=jnp.float32)
                  + bo_ref[...])


def _round_up(n, m):
    return ((n + m - 1) // m) * m


def _chip_config():
    """Generation-aware (tile cap, scoped-VMEM limit, #TensorCores)."""
    kind = ""
    try:
        kind = jax.devices()[0].device_kind.lower()
    except Exception:
        pass
    if "v7" in kind:
        # 64 MiB physical VMEM, 2 TensorCores -> smaller tiles, even grid steps.
        return 4096, 32 * 1024 * 1024, 2
    if "v5" in kind or "v6" in kind:
        # 128 MiB physical VMEM, 1 TensorCore -> big tiles, no forced split.
        return 8192, 64 * 1024 * 1024, 1
    # Unknown backend: conservative defaults.
    return 4096, 32 * 1024 * 1024, 1


def translation_field_forward(x, params, *, tb=None):
    """x: (B, IN_CH) float32 (or bf16). Returns (B, OUT_CH) float32."""
    B = x.shape[0]
    w01, wh, b, wo, bo = params
    if B == 0:
        return jnp.zeros((0, OUT_CH), jnp.float32)

    tb_cap, vmem_limit, n_cores = _chip_config()
    tb_req = tb_cap if tb is None else max(8, min(int(tb), tb_cap))

    # Sublane-align the batch tile; balance tiles across TensorCores on v7x
    # (even step count), keep a single big tile on single-TC chips.
    b8 = _round_up(B, 8)
    n_tiles = -(-b8 // tb_req)                    # cdiv
    if n_cores > 1:
        if n_tiles == 1 and b8 >= 2048:
            n_tiles = 2                           # worth splitting for 2 TCs
        elif n_tiles > 1:
            n_tiles = _round_up(n_tiles, n_cores)  # balanced megacore work
    tb = _round_up(-(-b8 // n_tiles), 8)
    padded_b = tb * n_tiles

    x = x.astype(jnp.bfloat16)
    if padded_b != B:
        x = jnp.pad(x, ((0, padded_b - B), (0, 0)))

    const2 = lambda i: (0, 0)
    const3 = lambda i: (0, 0, 0)

    out = pl.pallas_call(
        _mlp_kernel,
        out_shape=jax.ShapeDtypeStruct((padded_b, W), jnp.float32),
        grid_spec=pltpu.PrefetchScalarGridSpec(
            num_scalar_prefetch=0,
            grid=(n_tiles,),
            in_specs=[
                pl.BlockSpec((tb, IN_CH), lambda i: (i, 0)),   # x tile
                pl.BlockSpec(w01.shape, const2),               # (42, 256) bf16
                pl.BlockSpec(wh.shape, const3),                # (5, 128, 128) bf16
                pl.BlockSpec(b.shape, const3),                 # (6, 1, 128) f32
                pl.BlockSpec(wo.shape, const2),                # (128, 128) bf16
                pl.BlockSpec(bo.shape, const2),                # (1, 128) f32
            ],
            out_specs=pl.BlockSpec((tb, W), lambda i: (i, 0)),
        ),
        compiler_params=pltpu.CompilerParams(
            dimension_semantics=("parallel",),
            vmem_limit_bytes=vmem_limit,
        ),
    )(x, w01, wh, b, wo, bo)

    return out[:B, :OUT_CH]


def init_params(key):
    """Deterministic init matching the PyTorch module's __init__ (bf16 weights)."""
    keys = jax.random.split(key, D + 1)

    def xavier(k, fan_in, fan_out):
        # torch xavier_uniform_ on weight of shape (out, in); stored (in, out)
        bound = math.sqrt(6.0 / (fan_in + fan_out))
        return jax.random.uniform(k, (fan_in, fan_out), jnp.float32, -bound, bound)

    hidden_ws = []          # order: [w1, w2, w3, w4b, w5], each (W, W)
    biases = []
    w0 = w4a = None
    for i in range(D):
        if i == 0:
            fan_in = IN_CH
        elif i == SKIP:
            fan_in = W + IN_CH
        else:
            fan_in = W
        w = xavier(keys[i], fan_in, W)
        biases.append(jnp.zeros((1, W), jnp.float32))
        if i == 0:
            w0 = w
        elif i == SKIP:
            # split skip weight: rows [0:IN_CH] multiply input_xyz, rest h
            w4a = w[:IN_CH, :]
            hidden_ws.append(w[IN_CH:, :])
        else:
            hidden_ws.append(w)

    w01 = jnp.concatenate([w0, w4a], axis=1)       # (42, 256): [layer1 | skip]
    wh = jnp.stack(hidden_ws, axis=0)              # (5, W, W)
    b = jnp.stack(biases, axis=0)                  # (6, 1, W), f32
    # output layer: uniform(-1e-4, 1e-4) weight, zero bias; lane-pad 2 -> 128
    wo = jax.random.uniform(keys[D], (W, OUT_CH), jnp.float32, -1e-4, 1e-4)
    wo_pad = jnp.zeros((W, W), jnp.float32).at[:, :OUT_CH].set(wo)
    bo_pad = jnp.zeros((1, W), jnp.float32)

    bf16 = jnp.bfloat16
    return (w01.astype(bf16), wh.astype(bf16), b, wo_pad.astype(bf16), bo_pad)


def reference_forward(x, params):
    """Pure-jnp reference: same bf16-rounded weights/input, f32 activations."""
    w01, wh, b, wo, bo = params
    f = lambda a: a.astype(jnp.float32)
    relu = lambda v: jnp.maximum(v, 0.0)
    xf = f(x.astype(jnp.bfloat16))                 # same input rounding as kernel
    w0, w4a = f(w01[:, :W]), f(w01[:, W:])
    h = relu(xf @ w0 + b[0])
    h = relu(h @ f(wh[0]) + b[1])
    h = relu(h @ f(wh[1]) + b[2])
    h = relu(h @ f(wh[2]) + b[3])
    h = relu(xf @ w4a + h @ f(wh[3]) + b[4])
    h = relu(h @ f(wh[4]) + b[5])
    return (h @ f(wo) + bo)[:, :OUT_CH]


if __name__ == "__main__":
    key = jax.random.PRNGKey(0)
    k_x, k_x2, k_p = jax.random.split(key, 3)
    params = init_params(k_p)

    # Small single-tile case.
    B = 16
    x = jax.random.normal(k_x, (B, IN_CH), jnp.float32)
    out = jax.block_until_ready(translation_field_forward(x, params))
    ref = reference_forward(x, params)
    assert out.shape == (B, OUT_CH)
    # kernel uses bf16 activations; reference uses f32 activations on the same
    # bf16-rounded weights -> allow small bf16-level differences.
    assert jnp.allclose(out, ref, atol=2e-4, rtol=5e-2), (
        float(jnp.max(jnp.abs(out - ref))))

    # Non-multiple-of-8 batch with a small explicit tile: exercises padding and
    # the multi-step grid path (still a small shape).
    B2 = 300
    x2 = jax.random.normal(k_x2, (B2, IN_CH), jnp.float32)
    out2 = jax.block_until_ready(translation_field_forward(x2, params, tb=128))
    ref2 = reference_forward(x2, params)
    assert out2.shape == (B2, OUT_CH)
    assert jnp.allclose(out2, ref2, atol=2e-4, rtol=5e-2), (
        float(jnp.max(jnp.abs(out2 - ref2))))

    print("KERNEL_OK")
</pallas_src>

<mosaic_0001>
module attributes {stable_mosaic.version = 11 : i64} {
  func.func @_mlp_kernel(%arg0: i32, %arg1: memref<16x42xbf16, #tpu.memory_space<vmem>>, %arg2: memref<42x256xbf16, #tpu.memory_space<vmem>>, %arg3: memref<5x128x128xbf16, #tpu.memory_space<vmem>>, %arg4: memref<6x1x128xf32, #tpu.memory_space<vmem>>, %arg5: memref<128x128xbf16, #tpu.memory_space<vmem>>, %arg6: memref<1x128xf32, #tpu.memory_space<vmem>>, %arg7: memref<16x128xf32, #tpu.memory_space<vmem>>) attributes {dimension_semantics = [#tpu.dimension_semantics<parallel>], iteration_bounds = array<i64: 1>, scalar_prefetch = 0 : i64, scratch_operands = 0 : i64, tpu.core_type = #tpu.core_type<tc>, window_params = [{transform_indices = @transform_0, window_bounds = array<i64: 16, 42>}, {pipeline_mode = #tpu.pipeline_mode<synchronous>, transform_indices = @transform_1, window_bounds = array<i64: 42, 256>}, {pipeline_mode = #tpu.pipeline_mode<synchronous>, transform_indices = @transform_2, window_bounds = array<i64: 5, 128, 128>}, {pipeline_mode = #tpu.pipeline_mode<synchronous>, transform_indices = @transform_3, window_bounds = array<i64: 6, 1, 128>}, {pipeline_mode = #tpu.pipeline_mode<synchronous>, transform_indices = @transform_4, window_bounds = array<i64: 128, 128>}, {pipeline_mode = #tpu.pipeline_mode<synchronous>, transform_indices = @transform_5, window_bounds = array<i64: 1, 128>}, {transform_indices = @transform_6, window_bounds = array<i64: 16, 128>}]} {
    %c0 = arith.constant 0 : index
    %c0_0 = arith.constant 0 : index
    %0 = vector.load %arg1[%c0, %c0_0] : memref<16x42xbf16, #tpu.memory_space<vmem>>, vector<16x42xbf16>
    %c0_1 = arith.constant 0 : index
    %c0_2 = arith.constant 0 : index
    %1 = vector.load %arg2[%c0_1, %c0_2] : memref<42x256xbf16, #tpu.memory_space<vmem>>, vector<42x256xbf16>
    %cst = arith.constant dense<0.000000e+00> : vector<16x256xf32>
    %2 = tpu.matmul %0, %1, %cst {dimension_numbers = #tpu.dot_dimension_numbers<[1], [0], [0], [1], [0, 0, 1, 1], [], []>} : vector<16x42xbf16>, vector<42x256xbf16>, vector<16x256xf32> -> vector<16x256xf32>
    %3 = vector.extract_strided_slice %2 {offsets = [0, 128], sizes = [16, 128], strides = [1, 1]} : vector<16x256xf32> to vector<16x128xf32>
    %4 = vector.extract_strided_slice %2 {offsets = [0, 0], sizes = [16, 128], strides = [1, 1]} : vector<16x256xf32> to vector<16x128xf32>
    %c0_3 = arith.constant 0 : index
    %c0_4 = arith.constant 0 : index
    %c0_5 = arith.constant 0 : index
    %5 = vector.load %arg4[%c0_3, %c0_4, %c0_5] : memref<6x1x128xf32, #tpu.memory_space<vmem>>, vector<1x1x128xf32>
    %6 = vector.shape_cast %5 : vector<1x1x128xf32> to vector<1x128xf32>
    %7 = vector.broadcast %6 : vector<1x128xf32> to vector<16x128xf32>
    %8 = arith.addf %4, %7 : vector<16x128xf32>
    %cst_6 = arith.constant 0.000000e+00 : f32
    %9 = vector.broadcast %cst_6 : f32 to vector<16x128xf32>
    %10 = arith.maximumf %8, %9 : vector<16x128xf32>
    %c0_7 = arith.constant 0 : index
    %c0_8 = arith.constant 0 : index
    %c0_9 = arith.constant 0 : index
    %11 = vector.load %arg3[%c0_7, %c0_8, %c0_9] : memref<5x128x128xbf16, #tpu.memory_space<vmem>>, vector<1x128x128xbf16>
    %12 = vector.shape_cast %11 : vector<1x128x128xbf16> to vector<128x128xbf16>
    %c1 = arith.constant 1 : index
    %c0_10 = arith.constant 0 : index
    %c0_11 = arith.constant 0 : index
    %13 = vector.load %arg4[%c1, %c0_10, %c0_11] : memref<6x1x128xf32, #tpu.memory_space<vmem>>, vector<1x1x128xf32>
    %14 = vector.shape_cast %13 : vector<1x1x128xf32> to vector<1x128xf32>
    %15 = arith.truncf %10 : vector<16x128xf32> to vector<16x128xbf16>
    %cst_12 = arith.constant dense<0.000000e+00> : vector<16x128xf32>
    %16 = tpu.matmul %15, %12, %cst_12 {dimension_numbers = #tpu.dot_dimension_numbers<[1], [0], [0], [1], [0, 0, 1, 1], [], []>} : vector<16x128xbf16>, vector<128x128xbf16>, vector<16x128xf32> -> vector<16x128xf32>
    %17 = vector.broadcast %14 : vector<1x128xf32> to vector<16x128xf32>
    %18 = arith.addf %16, %17 : vector<16x128xf32>
    %cst_13 = arith.constant 0.000000e+00 : f32
    %19 = vector.broadcast %cst_13 : f32 to vector<16x128xf32>
    %20 = arith.maximumf %18, %19 : vector<16x128xf32>
    %c1_14 = arith.constant 1 : index
    %c0_15 = arith.constant 0 : index
    %c0_16 = arith.constant 0 : index
    %21 = vector.load %arg3[%c1_14, %c0_15, %c0_16] : memref<5x128x128xbf16, #tpu.memory_space<vmem>>, vector<1x128x128xbf16>
    %22 = vector.shape_cast %21 : vector<1x128x128xbf16> to vector<128x128xbf16>
    %c2 = arith.constant 2 : index
    %c0_17 = arith.constant 0 : index
    %c0_18 = arith.constant 0 : index
    %23 = vector.load %arg4[%c2, %c0_17, %c0_18] : memref<6x1x128xf32, #tpu.memory_space<vmem>>, vector<1x1x128xf32>
    %24 = vector.shape_cast %23 : vector<1x1x128xf32> to vector<1x128xf32>
    %25 = arith.truncf %20 : vector<16x128xf32> to vector<16x128xbf16>
    %cst_19 = arith.constant dense<0.000000e+00> : vector<16x128xf32>
    %26 = tpu.matmul %25, %22, %cst_19 {dimension_numbers = #tpu.dot_dimension_numbers<[1], [0], [0], [1], [0, 0, 1, 1], [], []>} : vector<16x128xbf16>, vector<128x128xbf16>, vector<16x128xf32> -> vector<16x128xf32>
    %27 = vector.broadcast %24 : vector<1x128xf32> to vector<16x128xf32>
    %28 = arith.addf %26, %27 : vector<16x128xf32>
    %cst_20 = arith.constant 0.000000e+00 : f32
    %29 = vector.broadcast %cst_20 : f32 to vector<16x128xf32>
    %30 = arith.maximumf %28, %29 : vector<16x128xf32>
    %c2_21 = arith.constant 2 : index
    %c0_22 = arith.constant 0 : index
    %c0_23 = arith.constant 0 : index
    %31 = vector.load %arg3[%c2_21, %c0_22, %c0_23] : memref<5x128x128xbf16, #tpu.memory_space<vmem>>, vector<1x128x128xbf16>
    %32 = vector.shape_cast %31 : vector<1x128x128xbf16> to vector<128x128xbf16>
    %c3 = arith.constant 3 : index
    %c0_24 = arith.constant 0 : index
    %c0_25 = arith.constant 0 : index
    %33 = vector.load %arg4[%c3, %c0_24, %c0_25] : memref<6x1x128xf32, #tpu.memory_space<vmem>>, vector<1x1x128xf32>
    %34 = vector.shape_cast %33 : vector<1x1x128xf32> to vector<1x128xf32>
    %35 = arith.truncf %30 : vector<16x128xf32> to vector<16x128xbf16>
    %cst_26 = arith.constant dense<0.000000e+00> : vector<16x128xf32>
    %36 = tpu.matmul %35, %32, %cst_26 {dimension_numbers = #tpu.dot_dimension_numbers<[1], [0], [0], [1], [0, 0, 1, 1], [], []>} : vector<16x128xbf16>, vector<128x128xbf16>, vector<16x128xf32> -> vector<16x128xf32>
    %37 = vector.broadcast %34 : vector<1x128xf32> to vector<16x128xf32>
    %38 = arith.addf %36, %37 : vector<16x128xf32>
    %cst_27 = arith.constant 0.000000e+00 : f32
    %39 = vector.broadcast %cst_27 : f32 to vector<16x128xf32>
    %40 = arith.maximumf %38, %39 : vector<16x128xf32>
    %41 = arith.truncf %40 : vector<16x128xf32> to vector<16x128xbf16>
    %c3_28 = arith.constant 3 : index
    %c0_29 = arith.constant 0 : index
    %c0_30 = arith.constant 0 : index
    %42 = vector.load %arg3[%c3_28, %c0_29, %c0_30] : memref<5x128x128xbf16, #tpu.memory_space<vmem>>, vector<1x128x128xbf16>
    %43 = vector.shape_cast %42 : vector<1x128x128xbf16> to vector<128x128xbf16>
    %cst_31 = arith.constant dense<0.000000e+00> : vector<16x128xf32>
    %44 = tpu.matmul %41, %43, %cst_31 {dimension_numbers = #tpu.dot_dimension_numbers<[1], [0], [0], [1], [0, 0, 1, 1], [], []>} : vector<16x128xbf16>, vector<128x128xbf16>, vector<16x128xf32> -> vector<16x128xf32>
    %45 = arith.addf %3, %44 : vector<16x128xf32>
    %c4 = arith.constant 4 : index
    %c0_32 = arith.constant 0 : index
    %c0_33 = arith.constant 0 : index
    %46 = vector.load %arg4[%c4, %c0_32, %c0_33] : memref<6x1x128xf32, #tpu.memory_space<vmem>>, vector<1x1x128xf32>
    %47 = vector.shape_cast %46 : vector<1x1x128xf32> to vector<1x128xf32>
    %48 = vector.broadcast %47 : vector<1x128xf32> to vector<16x128xf32>
    %49 = arith.addf %45, %48 : vector<16x128xf32>
    %cst_34 = arith.constant 0.000000e+00 : f32
    %50 = vector.broadcast %cst_34 : f32 to vector<16x128xf32>
    %51 = arith.maximumf %49, %50 : vector<16x128xf32>
    %c4_35 = arith.constant 4 : index
    %c0_36 = arith.constant 0 : index
    %c0_37 = arith.constant 0 : index
    %52 = vector.load %arg3[%c4_35, %c0_36, %c0_37] : memref<5x128x128xbf16, #tpu.memory_space<vmem>>, vector<1x128x128xbf16>
    %53 = vector.shape_cast %52 : vector<1x128x128xbf16> to vector<128x128xbf16>
    %c5 = arith.constant 5 : index
    %c0_38 = arith.constant 0 : index
    %c0_39 = arith.constant 0 : index
    %54 = vector.load %arg4[%c5, %c0_38, %c0_39] : memref<6x1x128xf32, #tpu.memory_space<vmem>>, vector<1x1x128xf32>
    %55 = vector.shape_cast %54 : vector<1x1x128xf32> to vector<1x128xf32>
    %56 = arith.truncf %51 : vector<16x128xf32> to vector<16x128xbf16>
    %cst_40 = arith.constant dense<0.000000e+00> : vector<16x128xf32>
    %57 = tpu.matmul %56, %53, %cst_40 {dimension_numbers = #tpu.dot_dimension_numbers<[1], [0], [0], [1], [0, 0, 1, 1], [], []>} : vector<16x128xbf16>, vector<128x128xbf16>, vector<16x128xf32> -> vector<16x128xf32>
    %58 = vector.broadcast %55 : vector<1x128xf32> to vector<16x128xf32>
    %59 = arith.addf %57, %58 : vector<16x128xf32>
    %cst_41 = arith.constant 0.000000e+00 : f32
    %60 = vector.broadcast %cst_41 : f32 to vector<16x128xf32>
    %61 = arith.maximumf %59, %60 : vector<16x128xf32>
    %62 = arith.truncf %61 : vector<16x128xf32> to vector<16x128xbf16>
    %c0_42 = arith.constant 0 : index
    %c0_43 = arith.constant 0 : index
    %63 = vector.load %arg5[%c0_42, %c0_43] : memref<128x128xbf16, #tpu.memory_space<vmem>>, vector<128x128xbf16>
    %cst_44 = arith.constant dense<0.000000e+00> : vector<16x128xf32>
    %64 = tpu.matmul %62, %63, %cst_44 {dimension_numbers = #tpu.dot_dimension_numbers<[1], [0], [0], [1], [0, 0, 1, 1], [], []>} : vector<16x128xbf16>, vector<128x128xbf16>, vector<16x128xf32> -> vector<16x128xf32>
    %c0_45 = arith.constant 0 : index
    %c0_46 = arith.constant 0 : index
    %65 = vector.load %arg6[%c0_45, %c0_46] : memref<1x128xf32, #tpu.memory_space<vmem>>, vector<1x128xf32>
    %66 = vector.broadcast %65 : vector<1x128xf32> to vector<16x128xf32>
    %67 = arith.addf %64, %66 : vector<16x128xf32>
    %c0_47 = arith.constant 0 : index
    %c0_48 = arith.constant 0 : index
    %68 = vector.load %arg7[%c0_47, %c0_48] : memref<16x128xf32, #tpu.memory_space<vmem>>, vector<16x128xf32>
    tpu.vector_store %arg7[%c0_47, %c0_48], %67 {strides = array<i32>} : memref<16x128xf32, #tpu.memory_space<vmem>>, vector<16x128xf32>,
    return
  }
  func.func @transform_0(%arg0: i32) -> (i32, i32) {
    %c0_i32 = arith.constant 0 : i32
    %c0_i32_0 = arith.constant 0 : i32
    return %arg0, %c0_i32 : i32, i32
  }
  func.func @transform_1(%arg0: i32) -> (i32, i32) {
    %c0_i32 = arith.constant 0 : i32
    %c0_i32_0 = arith.constant 0 : i32
    %c0_i32_1 = arith.constant 0 : i32
    return %c0_i32, %c0_i32_0 : i32, i32
  }
  func.func @transform_2(%arg0: i32) -> (i32, i32, i32) {
    %c0_i32 = arith.constant 0 : i32
    %c0_i32_0 = arith.constant 0 : i32
    %c0_i32_1 = arith.constant 0 : i32
    %c0_i32_2 = arith.constant 0 : i32
    return %c0_i32, %c0_i32_0, %c0_i32_1 : i32, i32, i32
  }
  func.func @transform_3(%arg0: i32) -> (i32, i32, i32) {
    %c0_i32 = arith.constant 0 : i32
    %c0_i32_0 = arith.constant 0 : i32
    %c0_i32_1 = arith.constant 0 : i32
    %c0_i32_2 = arith.constant 0 : i32
    return %c0_i32, %c0_i32_0, %c0_i32_1 : i32, i32, i32
  }
  func.func @transform_4(%arg0: i32) -> (i32, i32) {
    %c0_i32 = arith.constant 0 : i32
    %c0_i32_0 = arith.constant 0 : i32
    %c0_i32_1 = arith.constant 0 : i32
    return %c0_i32, %c0_i32_0 : i32, i32
  }
  func.func @transform_5(%arg0: i32) -> (i32, i32) {
    %c0_i32 = arith.constant 0 : i32
    %c0_i32_0 = arith.constant 0 : i32
    %c0_i32_1 = arith.constant 0 : i32
    return %c0_i32, %c0_i32_0 : i32, i32
  }
  func.func @transform_6(%arg0: i32) -> (i32, i32) {
    %c0_i32 = arith.constant 0 : i32
    %c0_i32_0 = arith.constant 0 : i32
    return %arg0, %c0_i32 : i32, i32
  }
}

</mosaic_0001>

<bundles_post_ra>
// kernel: tpu_custom_call.1
= control target key start
LH: loop header
LB: loop body
LE: loop exit
PB: predicated region body
PF: predicated region fallthrough
CT: control target
= control target key end

     0   :  { %11 = vsyncpa [#allocation3], 0  ;;  %s1555_s0 = inlined_call_operand.hbm [shape: bf16[16,42], index: 0, kind: input, shape index: {}]   ;;  %s1556_s1 = inlined_call_operand.hbm [shape: bf16[42,256], index: 1, kind: input, shape index: {}]   ;;  %s1557_s2 = inlined_call_operand.hbm [shape: bf16[5,128,128], index: 2, kind: input, shape index: {}]   ;;  %s1558_s3 = inlined_call_operand.vmem [shape: f32[6,1,128], index: 3, kind: input, shape index: {}]   ;;  %s1559_s4 = inlined_call_operand.hbm [shape: bf16[128,128], index: 4, kind: input, shape index: {}]   ;;  %s1560_s5 = inlined_call_operand.vmem [shape: f32[1,128], index: 5, kind: input, shape index: {}]   ;;  %s1561_s6 = inlined_call_operand.hbm [shape: f32[16,128], index: 6, kind: output, shape index: {}]  }
   0x1   :  { %12 = vsyncpa [#allocation6], 0 }
   0x2   :  { %13 = vsyncpa [#allocation9], 0 }
   0x3   :  { %14 = vsyncpa [#allocation4], 0  ;;  %s1339_s21 = smov [#allocation5]   ;;  %s1221_s25 = scalar_lea.hbm %s1556_s1, 768 }
   0x4   :  { %s32_s22 = sshll.u32 %s1339_s21, 4  ;;  %p1222_p0 = scmp.ne.s32.totalorder %s1556_s1, %s1221_s25  ;;  %s33_s22 = int_to_ptr.vmem [resolvable:$true] %s32_s22 }
   0x5   :  { %p1225_p1 = scmp.lt.u32.totalorder %s1221_s25, %s1556_s1 }
   0x7   :  { %p1227_p2 = pnand %p1225_p1, %p1222_p0 }
   0x9   :  { %1230 = shalt.err (!%p1227_p2)
}
   0xa   :  { %s1231_s30 = scalar_lea.vmem %s33_s22, 768  ;;  %p1236_p4 = scmp.lt.s32.totalorder %s33_s22, %s33_s22 }
   0xb   :  { %p1232_p3 = scmp.ne.s32.totalorder %s33_s22, %s1231_s30  ;;  %p1237_p5 = scmp.lt.s32.totalorder %s1231_s30, %s1231_s30 }
   0xd   :  { %p1238_p6 = por %p1237_p5, %p1236_p4 }
   0xf   :  { %p1239_p7 = pnand %p1238_p6, %p1232_p3 }
  0x11   :  { %1242 = shalt.err (!%p1239_p7)
}
  0x12   :  { %s1340_s7 = smov 128   ;;  %s1341_s8 = smov 8  }
  0x13   :  { %38 = dma.hbm_to_vmem [thread:$0]  %s1556_s1, 768, %s33_s22, [#allocation6], %s1340_s7, %s1340_s7, %s1341_s8  }
  0x14   :  { %s1342_s11 = smov [#allocation2]   ;;  %s1243_s15 = scalar_lea.hbm %s1555_s0, 128 }
  0x15   :  { %s20_s12 = sshll.u32 %s1342_s11, 4  ;;  %p1244_p8 = scmp.ne.s32.totalorder %s1555_s0, %s1243_s15  ;;  %s21_s12 = int_to_ptr.vmem [resolvable:$true] %s20_s12 }
  0x16   :  { %p1247_p9 = scmp.lt.u32.totalorder %s1243_s15, %s1555_s0 }
  0x18   :  { %p1249_p10 = pnand %p1247_p9, %p1244_p8 }
  0x1a   :  { %1252 = shalt.err (!%p1249_p10)
}
  0x1b   :  { %s1253_s20 = scalar_lea.vmem %s21_s12, 128  ;;  %p1258_p12 = scmp.lt.s32.totalorder %s21_s12, %s21_s12 }
  0x1c   :  { %p1254_p11 = scmp.ne.s32.totalorder %s21_s12, %s1253_s20  ;;  %p1259_p13 = scmp.lt.s32.totalorder %s1253_s20, %s1253_s20 }
  0x1e   :  { %p1260_p0 = por %p1259_p13, %p1258_p12 }
  0x20   :  { %p1261_p1 = pnand %p1260_p0, %p1254_p11 }
  0x22   :  { %1264 = shalt.err (!%p1261_p1)
}
  0x23   :  { %s1343_s1 = smov 64   ;;  %s1344_s21 = smov 4  }
  0x24   :  { %26 = dma.hbm_to_vmem [thread:$0]  %s1555_s0, 128, %s21_s12, [#allocation3], %s1343_s1, %s1343_s1, %s1344_s21  }
  0x25   :  { %s1345_s24 = smov [#allocation7]   ;;  %s1346_s26 = smov [#allocation8]  }
  0x26   :  { %s44_s25 = sshll.u32 %s1345_s24, 4  ;;  %s58_s27 = sshll.u32 %s1346_s26, 4  ;;  %s45_s25 = int_to_ptr.vmem [resolvable:$true] %s44_s25  ;;  %s1416_s27 = int_to_ptr.vmem [resolvable:$true] %s58_s27 }
  0x27   :  { %s1265_s30 = scalar_lea.hbm %s1557_s2, 5120 }
  0x28   :  { %p1266_p2 = scmp.ne.s32.totalorder %s1557_s2, %s1265_s30  ;;  %p1269_p3 = scmp.lt.u32.totalorder %s1265_s30, %s1557_s2 }
  0x2a   :  { %p1271_p4 = pnand %p1269_p3, %p1266_p2 }
  0x2c   :  { %1274 = shalt.err (!%p1271_p4)
}
  0x2d   :  { %s1275_s0 = scalar_lea.vmem %s45_s25, 5120  ;;  %p1280_p6 = scmp.lt.s32.totalorder %s45_s25, %s45_s25 }
  0x2e   :  { %p1276_p5 = scmp.ne.s32.totalorder %s45_s25, %s1275_s0  ;;  %p1281_p7 = scmp.lt.s32.totalorder %s1275_s0, %s1275_s0 }
  0x30   :  { %p1282_p8 = por %p1281_p7, %p1280_p6 }
  0x32   :  { %p1283_p9 = pnand %p1282_p8, %p1276_p5 }
  0x34   :  { %1286 = shalt.err (!%p1283_p9)
}
  0x35   :  { %50 = dma.hbm_to_vmem [thread:$0]  %s1557_s2, 5120, %s45_s25, [#allocation6], %s1343_s1, %s1343_s1, %s1344_s21  }
  0x36   :  { %s1287_s17 = scalar_lea.hbm %s1559_s4, 1024 }
  0x37   :  { %p1288_p10 = scmp.ne.s32.totalorder %s1559_s4, %s1287_s17  ;;  %p1291_p11 = scmp.lt.u32.totalorder %s1287_s17, %s1559_s4 }
  0x39   :  { %p1293_p12 = pnand %p1291_p11, %p1288_p10 }
  0x3b   :  { %1296 = shalt.err (!%p1293_p12)
}
  0x3c   :  { %s1297_s23 = scalar_lea.vmem %s1416_s27, 1024  ;;  %p1302_p0 = scmp.lt.s32.totalorder %s1416_s27, %s1416_s27 }
  0x3d   :  { %p1298_p13 = scmp.ne.s32.totalorder %s1416_s27, %s1297_s23  ;;  %p1303_p1 = scmp.lt.s32.totalorder %s1297_s23, %s1297_s23 }
  0x3f   :  { %p1304_p2 = por %p1303_p1, %p1302_p0 }
  0x41   :  { %p1305_p3 = pnand %p1304_p2, %p1298_p13 }
  0x43   :  { %1308 = shalt.err (!%p1305_p3)
}
  0x44   :  { %64 = dma.hbm_to_vmem [thread:$0]  %s1559_s4, 1024, %s1416_s27, [#allocation9], %s1343_s1, %s1343_s1, %s1344_s21  }
  0x45   :  { %1331 = dma.done.wait [#allocation3], 128  }
  0x46   :  { %1332 = vsyncadd [#allocation3], 4294967168 }
  0x47   :  { %1333 = dma.done.wait [#allocation6], 5888  }
  0x48   :  { %1334 = vsyncadd [#allocation6], 4294961408 }
  0x49   :  { %1335 = dma.done.wait [#allocation9], 1024  }
  0x4a   :  { %1336 = vsyncadd [#allocation9], 4294966272  ;;  %v1347_v0 = vmov 0   ;;  %v1348_v1 = vmov 0.0   ;;  %v1163_v2 = vld [vmem:[#allocation5 + $0x4] ss:$8 sps:$4 sm:$0xff]  }
  0x4b   :  { %164 = vmatprep.mubr.bf16.mxu0 %v1347_v0  ;;  %1031 = vmatprep.subr.bf16.mxu1 %v1348_v1  ;;  %v1165_v3 = vld [vmem:[#allocation5] ss:$8 sps:$4 sm:$0xff]   ;;  %v1166_v4 = vld [vmem:[#allocation5 + $0x14] ss:$8 sps:$4 sm:$0xff]   ;;  %v1168_v5 = vld [vmem:[#allocation5 + $0x10] ss:$8 sps:$4 sm:$0xff]  }
  0x4c   :  { %132 = vmatprep.subr.bf16.mxu0 %v1163_v2  ;;  %v1169_v6 = vld [vmem:[#allocation5 + $0x24] ss:$8 sps:$4 sm:$0x1f]   ;;  %vm125_vm0 = vcmask 1044480   ;;  %v1173_v8 = vld [vmem:[#allocation7] sm:$0xff]   ;;  %v1174_v9 = vld [vmem:[#allocation7 + $0x8] sm:$0xff]  }
  0x4d   :  { %133 = vmatpush1.bf16.msra.mxu0 %v1165_v3  ;;  %v1171_v7 = vld [vmem:[#allocation5 + $0x20] ss:$8 sps:$4 sm:$0x1f]   ;;  %1032 = vmatpush3.bf16.msra.mxu1 %v1173_v8  ;;  %v1172_v11 = vld [vmem:[#allocation2] sm:$0xff]   ;;  %vm121_vm1 = vcmask 343040   ;;  %v1177_v14 = vld [vmem:[#allocation7 + $0x20] sm:$0xff]  }
  0x4e   :  { %134 = vmatprep.subr.bf16.mxu0 %v1166_v4  ;;  %1033 = vmatprep.subr.bf16.mxu1 %v1348_v1  ;;  %v127_v10 = vsel %vm125_vm0, %v1171_v7, 0  ;;  %v1175_v12 = vld [vmem:[#allocation7 + $0x10] sm:$0xff]   ;;  %v1176_v13 = vld [vmem:[#allocation7 + $0x18] sm:$0xff]   ;;  %v1178_v15 = vld [vmem:[#allocation7 + $0x28] sm:$0xff]   ;;  %vm1349_vm2 = vmmov 0   ;;  %s1350_s12 = smov [#allocation10]  }
  0x4f   :  { %v1179_v16 = vld [vmem:[#allocation7 + $0x30] sm:$0xff]   ;;  %v1180_v17 = vld [vmem:[#allocation7 + $0x38] sm:$0xff]   ;;  %1047 = vmatprep.mubr.msk.bf16.mxu1 %vm1349_vm2, %v1348_v1  ;;  %v1181_v18 = vld [vmem:[#allocation7 + $0x40] sm:$0xff]   ;;  %s894_s14 = sshll.u32 %s1350_s12, 4  ;;  %s895_s14 = int_to_ptr.vmem [resolvable:$true] %s894_s14 }
  0x50   :  { %v1182_v19 = vld [vmem:[#allocation7 + $0x48] sm:$0xff]   ;;  %v1183_v20 = vld [vmem:[#allocation7 + $0x50] sm:$0xff]   ;;  %v1184_v21 = vld [vmem:[#allocation7 + $0x58] sm:$0xff]   ;;  %p1314_p5 = scmp.lt.s32.totalorder %s895_s14, %s895_s14 }
  0x51   :  { %135 = vmatpush1.bf16.msra.mxu0 %v1168_v5  ;;  %1034 = vmatpush3.bf16.msra.mxu1 %v1174_v9  ;;  %v1185_v22 = vld [vmem:[#allocation7 + $0x60] sm:$0xff]   ;;  %v1186_v23 = vld [vmem:[#allocation7 + $0x68] sm:$0xff]   ;;  %v1187_v34 = vld [vmem:[#allocation7 + $0x70] sm:$0xff]  }
  0x52   :  { %915 = vmatprep.subr.msk.bf16.mxu0 %vm125_vm0, %v1169_v6  ;;  %1035 = vmatprep.subr.bf16.mxu1 %v1348_v1  ;;  %v917_v24 = vld [vmem:[%s1558_s3] ss:$0 sm:$0xff]  ;;  %v1188_v35 = vld [vmem:[#allocation7 + $0x78] sm:$0xff]   ;;  %v1189_v36 = vld [vmem:[#allocation7 + $0x80] sm:$0xff]  }
  0x53   :  { %v1190_v37 = vld [vmem:[#allocation7 + $0x88] sm:$0xff]   ;;  %v1191_v38 = vld [vmem:[#allocation7 + $0x90] sm:$0xff]   ;;  %v1192_v39 = vld [vmem:[#allocation7 + $0x98] sm:$0xff]  }
  0x54   :  { %v1193_v40 = vld [vmem:[#allocation7 + $0xa0] sm:$0xff]   ;;  %v1194_v41 = vld [vmem:[#allocation7 + $0xa8] sm:$0xff]   ;;  %v1195_v52 = vld [vmem:[#allocation7 + $0xb0] sm:$0xff]  }
  0x55   :  { %137 = vmatpush1.bf16.msra.mxu0 %v127_v10  ;;  %1036 = vmatpush3.bf16.msra.mxu1 %v1175_v12  ;;  %v919_v42 = vld [vmem:[%s1558_s3 + $0x1] ss:$0 sm:$0xff]  ;;  %v1196_v53 = vld [vmem:[#allocation7 + $0xb8] sm:$0xff]   ;;  %v1197_v54 = vld [vmem:[#allocation7 + $0xc0] sm:$0xff]  }
  0x56   :  { %1051 = vmatprep.subr.bf16.mxu0 %v1348_v1  ;;  %1037 = vmatprep.subr.bf16.mxu1 %v1348_v1  ;;  %v1198_v55 = vld [vmem:[#allocation7 + $0xc8] sm:$0xff]   ;;  %v1199_v56 = vld [vmem:[#allocation7 + $0xd0] sm:$0xff]   ;;  %v1200_v57 = vld [vmem:[#allocation7 + $0xd8] sm:$0xff]  }
  0x57   :  { %v1201_v58 = vld [vmem:[#allocation7 + $0xe0] sm:$0xff]   ;;  %v1202_v59 = vld [vmem:[#allocation7 + $0xe8] sm:$0xff]   ;;  %v1203_v7 = vld [vmem:[#allocation7 + $0xf0] sm:$0xff]  }
  0x58   :  { %916 = vmatmul.mubr.msk.bf16.vlgmr.msra.gmra.mrb[0].mxu0 %vm121_vm1, %v1172_v11  ;;  %v929_v60 = vld [vmem:[%s1558_s3 + $0x2] ss:$0 sm:$0xff]  ;;  %v1204_v8 = vld [vmem:[#allocation7 + $0xf8] sm:$0xff]   ;;  %v1205_v9 = vld [vmem:[#allocation7 + $0x100] sm:$0xff]  }
  0x59   :  { %1038 = vmatpush3.bf16.msra.mxu1 %v1176_v13  ;;  %1067 = vmatprep.mubr.msk.bf16.mxu0 %vm1349_vm2, %v1348_v1  ;;  %v1206_v10 = vld [vmem:[#allocation7 + $0x108] sm:$0xff]   ;;  %v1207_v11 = vld [vmem:[#allocation7 + $0x110] sm:$0xff]   ;;  %v1208_v12 = vld [vmem:[#allocation7 + $0x118] sm:$0xff]  }
  0x5a   :  { %1039 = vmatprep.subr.bf16.mxu1 %v1348_v1  ;;  %1052 = vmatpush3.bf16.msra.mxu0 %v1181_v18  ;;  %v1209_v13 = vld [vmem:[#allocation7 + $0x120] sm:$0xff]  }
  0x5b   :  { %1053 = vmatprep.subr.bf16.mxu0 %v1348_v1 }
  0x5d   :  { %1040 = vmatpush3.bf16.msra.mxu1 %v1177_v14  ;;  %v939_v14 = vld [vmem:[%s1558_s3 + $0x3] ss:$0 sm:$0xff] }
  0x5e   :  { %1041 = vmatprep.subr.bf16.mxu1 %v1348_v1  ;;  %1054 = vmatpush3.bf16.msra.mxu0 %v1182_v19 }
  0x5f   :  { %1055 = vmatprep.subr.bf16.mxu0 %v1348_v1 }
  0x61   :  { %1042 = vmatpush3.bf16.msra.mxu1 %v1178_v15 }
  0x62   :  { %1043 = vmatprep.subr.bf16.mxu1 %v1348_v1  ;;  %1056 = vmatpush3.bf16.msra.mxu0 %v1183_v20 }
  0x63   :  { %1057 = vmatprep.subr.bf16.mxu0 %v1348_v1 }
  0x65   :  { %1044 = vmatpush3.bf16.msra.mxu1 %v1179_v16 }
  0x66   :  { %1045 = vmatprep.subr.bf16.mxu1 %v1348_v1  ;;  %1058 = vmatpush3.bf16.msra.mxu0 %v1184_v21 }
  0x67   :  { %1059 = vmatprep.subr.bf16.mxu0 %v1348_v1 }
  0x69   :  { %1046 = vmatpush3.bf16.msra.mxu1 %v1180_v17 }
  0x6a   :  { %1071 = vmatprep.subr.bf16.mxu1 %v1348_v1  ;;  %1060 = vmatpush3.bf16.msra.mxu0 %v1185_v22 }
  0x6b   :  { %1061 = vmatprep.subr.bf16.mxu0 %v1348_v1 }
  0x6e   :  { %1062 = vmatpush3.bf16.msra.mxu0 %v1186_v23 }
  0x6f   :  { %1063 = vmatprep.subr.bf16.mxu0 %v1348_v1 }
  0x72   :  { %1064 = vmatpush3.bf16.msra.mxu0 %v1187_v34  ;;  %v1218_v34 = vld [vmem:[#allocation8 + $0x28] sm:$0xff]  }
  0x73   :  { %1065 = vmatprep.subr.bf16.mxu0 %v1348_v1 }
  0x76   :  { %1066 = vmatpush3.bf16.msra.mxu0 %v1188_v35 }
  0x77   :  { %1091 = vmatprep.subr.bf16.mxu0 %v1348_v1 }
 0x12b   :  { %v166_v25 = vpop.f32.mrb[0].mxu0 }
 0x12c   :  { %v182_v26 = vadd.f32 %v917_v24, %v166_v25  ;;  %v1476_v27 = vpop.f32.mrb[1].mxu0  ;;  %v1211_v25 = vld [vmem:[#allocation7 + $0x130] sm:$0xff]  }
 0x12d   :  { %v170_v28 = vpop.f32.mrb[2].mxu0 }
 0x12e   :  { %v183_v29 = vadd.f32 %v917_v24, %v170_v28  ;;  %v1478_v30 = vpop.f32.mrb[3].mxu0  ;;  %v184_v31 = vmax.f32 %v182_v26, 0.0  ;;  %v1210_v24 = vld [vmem:[#allocation7 + $0x128] sm:$0xff]   ;;  %v1212_v26 = vld [vmem:[#allocation7 + $0x138] sm:$0xff]   ;;  %v1213_v28 = vld [vmem:[#allocation8] sm:$0xff]  }
 0x130   :  { %v185_v32 = vmax.f32 %v183_v29, 0.0  ;;  %v1214_v29 = vld [vmem:[#allocation8 + $0x8] sm:$0xff]  }
 0x132   :  { %v204_v33 = vpack.c.bf16 %v185_v32, %v184_v31  ;;  %v1215_v31 = vld [vmem:[#allocation8 + $0x10] sm:$0xff]   ;;  %v1216_v32 = vld [vmem:[#allocation8 + $0x18] sm:$0xff]  }
 0x134   :  { %1048 = vmatmul.mubr.bf16.vlgmr.msra.gmra.mrb[0].mxu1 %v204_v33  ;;  %v1217_v33 = vld [vmem:[#allocation8 + $0x20] sm:$0xff]  }
 0x135   :  { %1087 = vmatprep.mubr.msk.bf16.mxu1 %vm1349_vm2, %v1348_v1  ;;  %1072 = vmatpush3.bf16.msra.mxu1 %v1189_v36  ;;  %v957_v36 = vld [vmem:[%s1558_s3 + $0x4] ss:$0 sm:$0xff] }
 0x136   :  { %1073 = vmatprep.subr.bf16.mxu1 %v1348_v1 }
 0x139   :  { %1074 = vmatpush3.bf16.msra.mxu1 %v1190_v37 }
 0x13a   :  { %1075 = vmatprep.subr.bf16.mxu1 %v1348_v1 }
 0x13d   :  { %1076 = vmatpush3.bf16.msra.mxu1 %v1191_v38 }
 0x13e   :  { %1077 = vmatprep.subr.bf16.mxu1 %v1348_v1 }
 0x141   :  { %1078 = vmatpush3.bf16.msra.mxu1 %v1192_v39 }
 0x142   :  { %1079 = vmatprep.subr.bf16.mxu1 %v1348_v1 }
 0x145   :  { %1080 = vmatpush3.bf16.msra.mxu1 %v1193_v40 }
 0x146   :  { %1081 = vmatprep.subr.bf16.mxu1 %v1348_v1 }
 0x149   :  { %1082 = vmatpush3.bf16.msra.mxu1 %v1194_v41 }
 0x14a   :  { %1083 = vmatprep.subr.bf16.mxu1 %v1348_v1 }
 0x14d   :  { %1084 = vmatpush3.bf16.msra.mxu1 %v1195_v52 }
 0x14e   :  { %1085 = vmatprep.subr.bf16.mxu1 %v1348_v1 }
 0x151   :  { %1086 = vmatpush3.bf16.msra.mxu1 %v1196_v53 }
 0x152   :  { %1111 = vmatprep.subr.bf16.mxu1 %v1348_v1 }
 0x207   :  { %v293_v43 = vpop.f32.mrb[0].mxu1 }
 0x208   :  { %v294_v44 = vadd.f32 %v919_v42, %v293_v43  ;;  %v1049_v45 = vpop.f32.mrb[1].mxu1 }
 0x209   :  { %v296_v46 = vpop.f32.mrb[2].mxu1 }
 0x20a   :  { %v297_v47 = vadd.f32 %v919_v42, %v296_v46  ;;  %v1050_v48 = vpop.f32.mrb[3].mxu1  ;;  %v300_v49 = vmax.f32 %v294_v44, 0.0 }
 0x20b   :  { %v1220_v48 = vld [vmem:[#allocation8 + $0x38] sm:$0xff]  }
 0x20c   :  { %v301_v50 = vmax.f32 %v297_v47, 0.0  ;;  %v1219_v47 = vld [vmem:[#allocation8 + $0x30] sm:$0xff]  }
 0x20e   :  { %v321_v51 = vpack.c.bf16 %v301_v50, %v300_v49 }
 0x210   :  { %1068 = vmatmul.mubr.bf16.vlgmr.msra.gmra.mrb[4].mxu0 %v321_v51 }
 0x211   :  { %1107 = vmatprep.mubr.msk.bf16.mxu0 %vm1349_vm2, %v1348_v1  ;;  %1092 = vmatpush3.bf16.msra.mxu0 %v1197_v54 }
 0x212   :  { %1093 = vmatprep.subr.bf16.mxu0 %v1348_v1 }
 0x215   :  { %1094 = vmatpush3.bf16.msra.mxu0 %v1198_v55 }
 0x216   :  { %1095 = vmatprep.subr.bf16.mxu0 %v1348_v1 }
 0x219   :  { %1096 = vmatpush3.bf16.msra.mxu0 %v1199_v56 }
 0x21a   :  { %1097 = vmatprep.subr.bf16.mxu0 %v1348_v1 }
 0x21d   :  { %1098 = vmatpush3.bf16.msra.mxu0 %v1200_v57 }
 0x21e   :  { %1099 = vmatprep.subr.bf16.mxu0 %v1348_v1 }
 0x221   :  { %1100 = vmatpush3.bf16.msra.mxu0 %v1201_v58 }
 0x222   :  { %1101 = vmatprep.subr.bf16.mxu0 %v1348_v1 }
 0x225   :  { %1102 = vmatpush3.bf16.msra.mxu0 %v1202_v59 }
 0x226   :  { %1103 = vmatprep.subr.bf16.mxu0 %v1348_v1 }
 0x229   :  { %1104 = vmatpush3.bf16.msra.mxu0 %v1203_v7 }
 0x22a   :  { %1105 = vmatprep.subr.bf16.mxu0 %v1348_v1 }
 0x22d   :  { %1106 = vmatpush3.bf16.msra.mxu0 %v1204_v8 }
 0x22e   :  { %1131 = vmatprep.subr.bf16.mxu0 %v1348_v1 }
 0x2e3   :  { %v410_v61 = vpop.f32.mrb[4].mxu0 }
 0x2e4   :  { %v411_v62 = vadd.f32 %v929_v60, %v410_v61  ;;  %v1069_v63 = vpop.f32.mrb[5].mxu0 }
 0x2e5   :  { %v413_v0 = vpop.f32.mrb[6].mxu0 }
 0x2e6   :  { %v414_v2 = vadd.f32 %v929_v60, %v413_v0  ;;  %v1070_v3 = vpop.f32.mrb[7].mxu0  ;;  %v417_v4 = vmax.f32 %v411_v62, 0.0 }
 0x2e8   :  { %v418_v5 = vmax.f32 %v414_v2, 0.0 }
 0x2ea   :  { %v438_v6 = vpack.c.bf16 %v418_v5, %v417_v4 }
 0x2ec   :  { %1088 = vmatmul.mubr.bf16.vlgmr.msra.gmra.mrb[4].mxu1 %v438_v6 }
 0x2ed   :  { %1127 = vmatprep.mubr.msk.bf16.mxu1 %vm1349_vm2, %v1348_v1  ;;  %1112 = vmatpush3.bf16.msra.mxu1 %v1205_v9 }
 0x2ee   :  { %1113 = vmatprep.subr.bf16.mxu1 %v1348_v1 }
 0x2f1   :  { %1114 = vmatpush3.bf16.msra.mxu1 %v1206_v10 }
 0x2f2   :  { %1115 = vmatprep.subr.bf16.mxu1 %v1348_v1 }
 0x2f5   :  { %1116 = vmatpush3.bf16.msra.mxu1 %v1207_v11 }
 0x2f6   :  { %1117 = vmatprep.subr.bf16.mxu1 %v1348_v1 }
 0x2f9   :  { %1118 = vmatpush3.bf16.msra.mxu1 %v1208_v12 }
 0x2fa   :  { %1119 = vmatprep.subr.bf16.mxu1 %v1348_v1 }
 0x2fd   :  { %1120 = vmatpush3.bf16.msra.mxu1 %v1209_v13 }
 0x2fe   :  { %1121 = vmatprep.subr.bf16.mxu1 %v1348_v1 }
 0x301   :  { %1122 = vmatpush3.bf16.msra.mxu1 %v1210_v24 }
 0x302   :  { %1123 = vmatprep.subr.bf16.mxu1 %v1348_v1 }
 0x305   :  { %1124 = vmatpush3.bf16.msra.mxu1 %v1211_v25 }
 0x306   :  { %1125 = vmatprep.subr.bf16.mxu1 %v1348_v1 }
 0x309   :  { %1126 = vmatpush3.bf16.msra.mxu1 %v1212_v26 }
 0x3bf   :  { %v527_v15 = vpop.f32.mrb[4].mxu1 }
 0x3c0   :  { %v528_v16 = vadd.f32 %v939_v14, %v527_v15  ;;  %v1089_v17 = vpop.f32.mrb[5].mxu1 }
 0x3c1   :  { %v530_v18 = vpop.f32.mrb[6].mxu1 }
 0x3c2   :  { %v531_v19 = vadd.f32 %v939_v14, %v530_v18  ;;  %v1090_v20 = vpop.f32.mrb[7].mxu1  ;;  %v534_v21 = vmax.f32 %v528_v16, 0.0 }
 0x3c4   :  { %v535_v22 = vmax.f32 %v531_v19, 0.0 }
 0x3c6   :  { %v536_v23 = vpack.c.bf16 %v535_v22, %v534_v21 }
 0x3c8   :  { %1108 = vmatmul.mubr.bf16.vlgmr.msra.gmra.mrb[8].mxu0 %v536_v23 }
 0x3c9   :  { %1147 = vmatprep.mubr.msk.bf16.mxu0 %vm1349_vm2, %v1348_v1  ;;  %1132 = vmatpush3.bf16.msra.mxu0 %v1213_v28 }
 0x3ca   :  { %1133 = vmatprep.subr.bf16.mxu0 %v1348_v1 }
 0x3cd   :  { %1134 = vmatpush3.bf16.msra.mxu0 %v1214_v29 }
 0x3ce   :  { %1135 = vmatprep.subr.bf16.mxu0 %v1348_v1 }
 0x3d1   :  { %1136 = vmatpush3.bf16.msra.mxu0 %v1215_v31 }
 0x3d2   :  { %1137 = vmatprep.subr.bf16.mxu0 %v1348_v1 }
 0x3d5   :  { %1138 = vmatpush3.bf16.msra.mxu0 %v1216_v32 }
 0x3d6   :  { %1139 = vmatprep.subr.bf16.mxu0 %v1348_v1 }
 0x3d9   :  { %1140 = vmatpush3.bf16.msra.mxu0 %v1217_v33 }
 0x3da   :  { %1141 = vmatprep.subr.bf16.mxu0 %v1348_v1 }
 0x3dd   :  { %1142 = vmatpush3.bf16.msra.mxu0 %v1218_v34 }
 0x3de   :  { %1143 = vmatprep.subr.bf16.mxu0 %v1348_v1 }
 0x3e1   :  { %1144 = vmatpush3.bf16.msra.mxu0 %v1219_v47 }
 0x3e2   :  { %1145 = vmatprep.subr.bf16.mxu0 %v1348_v1  ;;  %v968_v1 = vld [vmem:[%s1560_s5] ss:$0 sm:$0xff] }
 0x3e5   :  { %1146 = vmatpush3.bf16.msra.mxu0 %v1220_v48 }
 0x49b   :  { %v636_v35 = vpop.f32.mrb[8].mxu0 }
 0x49c   :  { %v643_v37 = vadd.f32 %v636_v35, %v1476_v27  ;;  %v1109_v38 = vpop.f32.mrb[9].mxu0  ;;  %v959_v27 = vld [vmem:[%s1558_s3 + $0x5] ss:$0 sm:$0xff]  ;;  %s1309_s3 = scalar_lea.vmem %s895_s14, 256 }
 0x49d   :  { %v639_v39 = vpop.f32.mrb[10].mxu0  ;;  %p1310_p4 = scmp.ne.s32.totalorder %s895_s14, %s1309_s3  ;;  %p1315_p6 = scmp.lt.s32.totalorder %s1309_s3, %s1309_s3 }
 0x49e   :  { %v653_v40 = vadd.f32 %v957_v36, %v643_v37  ;;  %v644_v41 = vadd.f32 %v639_v39, %v1478_v30  ;;  %v1110_v42 = vpop.f32.mrb[11].mxu0 }
 0x49f   :  { %p1316_p7 = por %p1315_p6, %p1314_p5 }
 0x4a0   :  { %v654_v43 = vadd.f32 %v957_v36, %v644_v41  ;;  %v655_v44 = vmax.f32 %v653_v40, 0.0 }
 0x4a1   :  { %p1317_p8 = pnand %p1316_p7, %p1310_p4 }
 0x4a2   :  { %v656_v45 = vmax.f32 %v654_v43, 0.0 }
 0x4a4   :  { %v676_v46 = vpack.c.bf16 %v656_v45, %v655_v44 }
 0x4a6   :  { %1128 = vmatmul.mubr.bf16.vlgmr.msra.gmra.mrb[8].mxu1 %v676_v46 }
 0x579   :  { %v765_v49 = vpop.f32.mrb[8].mxu1 }
 0x57a   :  { %v766_v50 = vadd.f32 %v959_v27, %v765_v49  ;;  %v1129_v51 = vpop.f32.mrb[9].mxu1 }
 0x57b   :  { %v768_v30 = vpop.f32.mrb[10].mxu1 }
 0x57c   :  { %v769_v52 = vadd.f32 %v959_v27, %v768_v30  ;;  %v1130_v53 = vpop.f32.mrb[11].mxu1  ;;  %v772_v54 = vmax.f32 %v766_v50, 0.0 }
 0x57e   :  { %v773_v55 = vmax.f32 %v769_v52, 0.0 }
 0x580   :  { %v774_v56 = vpack.c.bf16 %v773_v55, %v772_v54 }
 0x582   :  { %1148 = vmatmul.mubr.bf16.vlgmr.msra.gmra.mrb[12].mxu0 %v774_v56 }
 0x655   :  { %v880_v57 = vpop.f32.mrb[12].mxu0 }
 0x656   :  { %v881_v58 = vadd.f32 %v968_v1, %v880_v57  ;;  %v1149_v59 = vpop.f32.mrb[13].mxu0 }
 0x657   :  { %v883_v60 = vpop.f32.mrb[14].mxu0 }
 0x658   :  { %887 = vst [vmem:[#allocation10] sm:$0xff] %v881_v58  ;;  %v884_v61 = vadd.f32 %v968_v1, %v883_v60  ;;  %v1150_v62 = vpop.f32.mrb[15].mxu0 }
 0x65a   :  { %888 = vst [vmem:[#allocation10 + $0x8] sm:$0xff] %v884_v61 }
 0x65b   :  { %1320 = shalt.err (!%p1317_p8)
}
 0x65c   :  { %s1321_s16 = scalar_lea.hbm %s1561_s6, 256 }
 0x65d   :  { %p1322_p9 = scmp.ne.s32.totalorder %s1561_s6, %s1321_s16  ;;  %p1325_p10 = scmp.lt.u32.totalorder %s1321_s16, %s1561_s6 }
 0x65f   :  { %p1327_p11 = pnand %p1325_p10, %p1322_p9 }
 0x661   :  { %1330 = shalt.err (!%p1327_p11)
}
 0x662   :  { %900 = dma.vmem_to_hbm [thread:$0]  %s895_s14, 256, %s1561_s6, [#allocation4], %s1340_s7, %s1340_s7, %s1341_s8  }
 0x663   :  { %1337 = dma.done.wait [#allocation4], 256  }
 0x664   :  { %1338 = vsyncadd [#allocation4], 4294967040 }
 0x665   :  { %904 = vsyncpa [#allocation3], 1 }
 0x666   :  { %905 = vsyncpa [#allocation6], 1 }
 0x667   :  { %906 = vsyncpa [#allocation9], 1 }
 0x668   :  { %907 = vsyncpa [#allocation4], 1 }

</bundles_post_ra>
